<compile_context>
chip_gen: v7x
topology: tpu7x:2x2x1
jax: 0.10.0
libtpu: 0.0.40
codegen_flags: <defaults>
</compile_context>

<pallas_src>
import functools

import jax
import jax.numpy as jnp
from jax.experimental import pallas as pl
from jax.experimental.pallas import tpu as pltpu


def _res131_kernel(x_ref, w1_ref, b1_ref, w2_ref, b2_ref, w3_ref, b3_ref,
                   masks_ref, out_ref, *, H, W):
    # x_ref    : (1, Cin,  P)      input (also the residual), P = H*W
    # w1_ref   : (Cmid, Cin)       1x1 conv (BN1 folded)
    # b1_ref   : (Cmid, 1)         BN1 shift
    # w2_ref   : (Cmid, 9*Cmid)    3x3 conv as im2col weight (BN2 folded),
    #                              K order = tap-major, cin-minor
    # b2_ref   : (Cmid, 1)         BN2 shift
    # w3_ref   : (Cout, Cmid)      1x1 conv (conv bias + BN3 folded)
    # b3_ref   : (Cout, 1)         folded bias+BN3 shift
    # masks_ref: (9, P)            per-tap zero-padding masks (f32 0/1)
    # out_ref  : (1, Cout, P)
    P = H * W

    x = x_ref[0].astype(jnp.float32)                      # (Cin, P)

    # --- Stage 1: 1x1 conv + BN + ReLU --------------------------------------
    y1 = jnp.dot(w1_ref[...], x, preferred_element_type=jnp.float32)
    y1 = jnp.maximum(y1 + b1_ref[...], 0.0)               # (Cmid, P)

    # --- Stage 2: 3x3 conv (pad=1) + BN + ReLU ------------------------------
    # Build the (9*Cmid, P) im2col operand with lane rolls + boundary masks,
    # then a single K = 9*Cmid matmul.
    masks = masks_ref[...]                                 # (9, P)
    taps = []
    for dy in (-1, 0, 1):
        for dx in (-1, 0, 1):
            t = (dy + 1) * 3 + (dx + 1)
            d = dy * W + dx
            shifted = y1 if d == 0 else pltpu.roll(y1, shift=(-d) % P, axis=1)
            if t != 4:  # center tap needs no masking
                shifted = shifted * masks[t:t + 1, :]
            taps.append(shifted)
    patches = jnp.concatenate(taps, axis=0)                # (9*Cmid, P)

    y2 = jnp.dot(w2_ref[...], patches, preferred_element_type=jnp.float32)
    y2 = jnp.maximum(y2 + b2_ref[...], 0.0)                # (Cmid, P)

    # --- Stage 3: 1x1 conv (+bias) + BN, residual add, ReLU -----------------
    y3 = jnp.dot(w3_ref[...], y2, preferred_element_type=jnp.float32)
    y3 = y3 + b3_ref[...]                                  # (Cout, P)
    out = jnp.maximum(y3 + x, 0.0)

    out_ref[...] = out[None].astype(out_ref.dtype)


def _fold_bn(w_oihw, gamma, beta, mean, var, eps, conv_bias=None):
    """Fold eval-mode BN (and optional conv bias) into conv weight + shift."""
    s = gamma.astype(jnp.float32) * jax.lax.rsqrt(var.astype(jnp.float32) + eps)
    w_f = w_oihw.astype(jnp.float32) * s[:, None, None, None]
    if conv_bias is None:
        shift = beta.astype(jnp.float32) - s * mean.astype(jnp.float32)
    else:
        shift = beta.astype(jnp.float32) + s * (
            conv_bias.astype(jnp.float32) - mean.astype(jnp.float32))
    return w_f, shift


@jax.jit
def residual131_forward(x, w1, g1, be1, m1, v1, w2, g2, be2, m2, v2,
                        w3, b3conv, g3, be3, m3, v3, eps=1e-5):
    """x: (N, Cin, H, W) -> (N, Cout, H, W) with Cin == Cout."""
    N, Cin, H, W = x.shape
    Cmid = w1.shape[0]
    Cout = w3.shape[0]
    P = H * W

    # Fold BN (eval mode, running stats) + conv bias into weights / shifts.
    w1f, sh1 = _fold_bn(w1, g1, be1, m1, v1, eps)               # (Cmid,Cin,1,1)
    w2f, sh2 = _fold_bn(w2, g2, be2, m2, v2, eps)               # (Cmid,Cmid,3,3)
    w3f, sh3 = _fold_bn(w3, g3, be3, m3, v3, eps, conv_bias=b3conv)

    w1m = w1f.reshape(Cmid, Cin)
    # K order must match the in-kernel tap stacking: tap-major, cin-minor.
    w2m = jnp.transpose(w2f, (0, 2, 3, 1)).reshape(Cmid, 9 * Cmid)
    w3m = w3f.reshape(Cout, Cmid)
    sh1 = sh1.reshape(Cmid, 1)
    sh2 = sh2.reshape(Cmid, 1)
    sh3 = sh3.reshape(Cout, 1)

    # Per-tap zero-padding masks for the 3x3 conv in flattened (H*W) space.
    p = jnp.arange(P, dtype=jnp.int32)
    row, col = p // W, p % W
    mask_list = []
    for dy in (-1, 0, 1):
        for dx in (-1, 0, 1):
            valid = ((row + dy) >= 0) & ((row + dy) < H) & \
                    ((col + dx) >= 0) & ((col + dx) < W)
            mask_list.append(valid)
    masks = jnp.stack(mask_list, axis=0).astype(jnp.float32)    # (9, P)

    x_flat = x.reshape(N, Cin, P)                               # channel-major

    out_flat = pl.pallas_call(
        functools.partial(_res131_kernel, H=H, W=W),
        out_shape=jax.ShapeDtypeStruct((N, Cout, P), x.dtype),
        grid_spec=pltpu.PrefetchScalarGridSpec(
            num_scalar_prefetch=0,
            grid=(N,),
            in_specs=[
                pl.BlockSpec((1, Cin, P), lambda n: (n, 0, 0)),
                pl.BlockSpec((Cmid, Cin), lambda n: (0, 0)),
                pl.BlockSpec((Cmid, 1), lambda n: (0, 0)),
                pl.BlockSpec((Cmid, 9 * Cmid), lambda n: (0, 0)),
                pl.BlockSpec((Cmid, 1), lambda n: (0, 0)),
                pl.BlockSpec((Cout, Cmid), lambda n: (0, 0)),
                pl.BlockSpec((Cout, 1), lambda n: (0, 0)),
                pl.BlockSpec((9, P), lambda n: (0, 0)),
            ],
            out_specs=pl.BlockSpec((1, Cout, P), lambda n: (n, 0, 0)),
        ),
        compiler_params=pltpu.CompilerParams(
            dimension_semantics=("parallel",)),
    )(x_flat, w1m, sh1, w2m, sh2, w3m, sh3, masks)

    return out_flat.reshape(N, Cout, H, W)


def _reference(x, w1, g1, be1, m1, v1, w2, g2, be2, m2, v2,
               w3, b3conv, g3, be3, m3, v3, eps=1e-5):
    def bn(y, g, b, m, v):
        inv = jax.lax.rsqrt(v + eps)
        return ((y - m[None, :, None, None]) * inv[None, :, None, None]
                * g[None, :, None, None] + b[None, :, None, None])

    def conv(y, w, pad):
        return jax.lax.conv_general_dilated(
            y, w, (1, 1), pad, dimension_numbers=("NCHW", "OIHW", "NCHW"))

    res = x
    y = jnp.maximum(bn(conv(x, w1, ((0, 0), (0, 0))), g1, be1, m1, v1), 0.0)
    y = jnp.maximum(bn(conv(y, w2, ((1, 1), (1, 1))), g2, be2, m2, v2), 0.0)
    y = conv(y, w3, ((0, 0), (0, 0))) + b3conv[None, :, None, None]
    y = bn(y, g3, be3, m3, v3)
    return jnp.maximum(y + res, 0.0)


if __name__ == "__main__":
    key = jax.random.PRNGKey(0)
    ks = jax.random.split(key, 18)

    # Residual131(in_channels=32, mid_channels=16, out_channels=32); residual
    # add requires in_channels == out_channels.
    N, Cin, Cmid, Cout, H, W = 2, 32, 16, 32, 16, 16

    x = jax.random.normal(ks[0], (N, Cin, H, W), dtype=jnp.float32)

    # convblock_in: 1x1 conv (no bias) + BN
    w1 = 0.2 * jax.random.normal(ks[1], (Cmid, Cin, 1, 1), dtype=jnp.float32)
    g1 = 1.0 + 0.1 * jax.random.normal(ks[2], (Cmid,), dtype=jnp.float32)
    be1 = 0.1 * jax.random.normal(ks[3], (Cmid,), dtype=jnp.float32)
    m1 = 0.1 * jax.random.normal(ks[4], (Cmid,), dtype=jnp.float32)
    v1 = jnp.abs(jax.random.normal(ks[5], (Cmid,), dtype=jnp.float32)) + 0.5

    # convblock_mid: 3x3 conv (no bias, pad=1) + BN
    w2 = 0.1 * jax.random.normal(ks[6], (Cmid, Cmid, 3, 3), dtype=jnp.float32)
    g2 = 1.0 + 0.1 * jax.random.normal(ks[7], (Cmid,), dtype=jnp.float32)
    be2 = 0.1 * jax.random.normal(ks[8], (Cmid,), dtype=jnp.float32)
    m2 = 0.1 * jax.random.normal(ks[9], (Cmid,), dtype=jnp.float32)
    v2 = jnp.abs(jax.random.normal(ks[10], (Cmid,), dtype=jnp.float32)) + 0.5

    # conv1_out: 1x1 conv WITH bias, then BN
    w3 = 0.2 * jax.random.normal(ks[11], (Cout, Cmid, 1, 1), dtype=jnp.float32)
    b3conv = 0.1 * jax.random.normal(ks[12], (Cout,), dtype=jnp.float32)
    g3 = 1.0 + 0.1 * jax.random.normal(ks[13], (Cout,), dtype=jnp.float32)
    be3 = 0.1 * jax.random.normal(ks[14], (Cout,), dtype=jnp.float32)
    m3 = 0.1 * jax.random.normal(ks[15], (Cout,), dtype=jnp.float32)
    v3 = jnp.abs(jax.random.normal(ks[16], (Cout,), dtype=jnp.float32)) + 0.5

    out = residual131_forward(x, w1, g1, be1, m1, v1, w2, g2, be2, m2, v2,
                              w3, b3conv, g3, be3, m3, v3)
    out = jax.block_until_ready(out)

    ref = _reference(x, w1, g1, be1, m1, v1, w2, g2, be2, m2, v2,
                     w3, b3conv, g3, be3, m3, v3)

    assert out.shape == (N, Cout, H, W)
    assert jnp.allclose(out, ref, atol=5e-4, rtol=5e-4), "mismatch vs reference"

    print("KERNEL_OK")
</pallas_src>

<mosaic_0001>
module attributes {stable_mosaic.version = 11 : i64} {
  func.func @_res131_kernel(%arg0: i32, %arg1: memref<1x32x256xf32, #tpu.memory_space<vmem>>, %arg2: memref<16x32xf32, #tpu.memory_space<vmem>>, %arg3: memref<16x1xf32, #tpu.memory_space<vmem>>, %arg4: memref<16x144xf32, #tpu.memory_space<vmem>>, %arg5: memref<16x1xf32, #tpu.memory_space<vmem>>, %arg6: memref<32x16xf32, #tpu.memory_space<vmem>>, %arg7: memref<32x1xf32, #tpu.memory_space<vmem>>, %arg8: memref<9x256xf32, #tpu.memory_space<vmem>>, %arg9: memref<1x32x256xf32, #tpu.memory_space<vmem>>) attributes {dimension_semantics = [#tpu.dimension_semantics<parallel>], iteration_bounds = array<i64: 2>, scalar_prefetch = 0 : i64, scratch_operands = 0 : i64, tpu.core_type = #tpu.core_type<tc>, window_params = [{transform_indices = @transform_0, window_bounds = array<i64: 1, 32, 256>}, {pipeline_mode = #tpu.pipeline_mode<synchronous>, transform_indices = @transform_1, window_bounds = array<i64: 16, 32>}, {pipeline_mode = #tpu.pipeline_mode<synchronous>, transform_indices = @transform_2, window_bounds = array<i64: 16, 1>}, {pipeline_mode = #tpu.pipeline_mode<synchronous>, transform_indices = @transform_3, window_bounds = array<i64: 16, 144>}, {pipeline_mode = #tpu.pipeline_mode<synchronous>, transform_indices = @transform_4, window_bounds = array<i64: 16, 1>}, {pipeline_mode = #tpu.pipeline_mode<synchronous>, transform_indices = @transform_5, window_bounds = array<i64: 32, 16>}, {pipeline_mode = #tpu.pipeline_mode<synchronous>, transform_indices = @transform_6, window_bounds = array<i64: 32, 1>}, {pipeline_mode = #tpu.pipeline_mode<synchronous>, transform_indices = @transform_7, window_bounds = array<i64: 9, 256>}, {transform_indices = @transform_8, window_bounds = array<i64: 1, 32, 256>}]} {
    %c0 = arith.constant 0 : index
    %c0_0 = arith.constant 0 : index
    %c0_1 = arith.constant 0 : index
    %0 = vector.load %arg1[%c0, %c0_0, %c0_1] : memref<1x32x256xf32, #tpu.memory_space<vmem>>, vector<1x32x256xf32>
    %1 = vector.shape_cast %0 : vector<1x32x256xf32> to vector<32x256xf32>
    %c0_2 = arith.constant 0 : index
    %c0_3 = arith.constant 0 : index
    %2 = vector.load %arg2[%c0_2, %c0_3] : memref<16x32xf32, #tpu.memory_space<vmem>>, vector<16x32xf32>
    %cst = arith.constant dense<0.000000e+00> : vector<16x256xf32>
    %3 = tpu.matmul %2, %1, %cst {dimension_numbers = #tpu.dot_dimension_numbers<[1], [0], [0], [1], [0, 0, 1, 1], [], []>} : vector<16x32xf32>, vector<32x256xf32>, vector<16x256xf32> -> vector<16x256xf32>
    %c0_4 = arith.constant 0 : index
    %c0_5 = arith.constant 0 : index
    %4 = vector.load %arg3[%c0_4, %c0_5] : memref<16x1xf32, #tpu.memory_space<vmem>>, vector<16x1xf32>
    %5 = vector.broadcast %4 : vector<16x1xf32> to vector<16x256xf32>
    %6 = arith.addf %3, %5 : vector<16x256xf32>
    %cst_6 = arith.constant 0.000000e+00 : f32
    %7 = vector.broadcast %cst_6 : f32 to vector<16x256xf32>
    %8 = arith.maximumf %6, %7 : vector<16x256xf32>
    %c0_7 = arith.constant 0 : index
    %c0_8 = arith.constant 0 : index
    %9 = vector.load %arg8[%c0_7, %c0_8] : memref<9x256xf32, #tpu.memory_space<vmem>>, vector<9x256xf32>
    %c17_i32 = arith.constant 17 : i32
    %10 = tpu.dynamic_rotate %8 by %c17_i32 dim 1 : vector<16x256xf32>, i32 -> vector<16x256xf32>
    %11 = vector.extract_strided_slice %9 {offsets = [0, 0], sizes = [1, 256], strides = [1, 1]} : vector<9x256xf32> to vector<1x256xf32>
    %12 = vector.broadcast %11 : vector<1x256xf32> to vector<16x256xf32>
    %13 = arith.mulf %10, %12 : vector<16x256xf32>
    %c16_i32 = arith.constant 16 : i32
    %14 = tpu.dynamic_rotate %8 by %c16_i32 dim 1 : vector<16x256xf32>, i32 -> vector<16x256xf32>
    %15 = vector.extract_strided_slice %9 {offsets = [1, 0], sizes = [1, 256], strides = [1, 1]} : vector<9x256xf32> to vector<1x256xf32>
    %16 = vector.broadcast %15 : vector<1x256xf32> to vector<16x256xf32>
    %17 = arith.mulf %14, %16 : vector<16x256xf32>
    %c15_i32 = arith.constant 15 : i32
    %18 = tpu.dynamic_rotate %8 by %c15_i32 dim 1 : vector<16x256xf32>, i32 -> vector<16x256xf32>
    %19 = vector.extract_strided_slice %9 {offsets = [2, 0], sizes = [1, 256], strides = [1, 1]} : vector<9x256xf32> to vector<1x256xf32>
    %20 = vector.broadcast %19 : vector<1x256xf32> to vector<16x256xf32>
    %21 = arith.mulf %18, %20 : vector<16x256xf32>
    %c1_i32 = arith.constant 1 : i32
    %22 = tpu.dynamic_rotate %8 by %c1_i32 dim 1 : vector<16x256xf32>, i32 -> vector<16x256xf32>
    %23 = vector.extract_strided_slice %9 {offsets = [3, 0], sizes = [1, 256], strides = [1, 1]} : vector<9x256xf32> to vector<1x256xf32>
    %24 = vector.broadcast %23 : vector<1x256xf32> to vector<16x256xf32>
    %25 = arith.mulf %22, %24 : vector<16x256xf32>
    %c255_i32 = arith.constant 255 : i32
    %26 = tpu.dynamic_rotate %8 by %c255_i32 dim 1 : vector<16x256xf32>, i32 -> vector<16x256xf32>
    %27 = vector.extract_strided_slice %9 {offsets = [5, 0], sizes = [1, 256], strides = [1, 1]} : vector<9x256xf32> to vector<1x256xf32>
    %28 = vector.broadcast %27 : vector<1x256xf32> to vector<16x256xf32>
    %29 = arith.mulf %26, %28 : vector<16x256xf32>
    %c241_i32 = arith.constant 241 : i32
    %30 = tpu.dynamic_rotate %8 by %c241_i32 dim 1 : vector<16x256xf32>, i32 -> vector<16x256xf32>
    %31 = vector.extract_strided_slice %9 {offsets = [6, 0], sizes = [1, 256], strides = [1, 1]} : vector<9x256xf32> to vector<1x256xf32>
    %32 = vector.broadcast %31 : vector<1x256xf32> to vector<16x256xf32>
    %33 = arith.mulf %30, %32 : vector<16x256xf32>
    %c240_i32 = arith.constant 240 : i32
    %34 = tpu.dynamic_rotate %8 by %c240_i32 dim 1 : vector<16x256xf32>, i32 -> vector<16x256xf32>
    %35 = vector.extract_strided_slice %9 {offsets = [7, 0], sizes = [1, 256], strides = [1, 1]} : vector<9x256xf32> to vector<1x256xf32>
    %36 = vector.broadcast %35 : vector<1x256xf32> to vector<16x256xf32>
    %37 = arith.mulf %34, %36 : vector<16x256xf32>
    %c239_i32 = arith.constant 239 : i32
    %38 = tpu.dynamic_rotate %8 by %c239_i32 dim 1 : vector<16x256xf32>, i32 -> vector<16x256xf32>
    %39 = vector.extract_strided_slice %9 {offsets = [8, 0], sizes = [1, 256], strides = [1, 1]} : vector<9x256xf32> to vector<1x256xf32>
    %40 = vector.broadcast %39 : vector<1x256xf32> to vector<16x256xf32>
    %41 = arith.mulf %38, %40 : vector<16x256xf32>
    %42 = tpu.concatenate %13, %17, %21, %25, %8, %29, %33, %37, %41 in 0 : vector<16x256xf32>, vector<16x256xf32>, vector<16x256xf32>, vector<16x256xf32>, vector<16x256xf32>, vector<16x256xf32>, vector<16x256xf32>, vector<16x256xf32>, vector<16x256xf32> -> vector<144x256xf32>
    %c0_9 = arith.constant 0 : index
    %c0_10 = arith.constant 0 : index
    %43 = vector.load %arg4[%c0_9, %c0_10] : memref<16x144xf32, #tpu.memory_space<vmem>>, vector<16x144xf32>
    %cst_11 = arith.constant dense<0.000000e+00> : vector<16x256xf32>
    %44 = tpu.matmul %43, %42, %cst_11 {dimension_numbers = #tpu.dot_dimension_numbers<[1], [0], [0], [1], [0, 0, 1, 1], [], []>} : vector<16x144xf32>, vector<144x256xf32>, vector<16x256xf32> -> vector<16x256xf32>
    %c0_12 = arith.constant 0 : index
    %c0_13 = arith.constant 0 : index
    %45 = vector.load %arg5[%c0_12, %c0_13] : memref<16x1xf32, #tpu.memory_space<vmem>>, vector<16x1xf32>
    %46 = vector.broadcast %45 : vector<16x1xf32> to vector<16x256xf32>
    %47 = arith.addf %44, %46 : vector<16x256xf32>
    %cst_14 = arith.constant 0.000000e+00 : f32
    %48 = vector.broadcast %cst_14 : f32 to vector<16x256xf32>
    %49 = arith.maximumf %47, %48 : vector<16x256xf32>
    %c0_15 = arith.constant 0 : index
    %c0_16 = arith.constant 0 : index
    %50 = vector.load %arg6[%c0_15, %c0_16] : memref<32x16xf32, #tpu.memory_space<vmem>>, vector<32x16xf32>
    %cst_17 = arith.constant dense<0.000000e+00> : vector<32x256xf32>
    %51 = tpu.matmul %50, %49, %cst_17 {dimension_numbers = #tpu.dot_dimension_numbers<[1], [0], [0], [1], [0, 0, 1, 1], [], []>} : vector<32x16xf32>, vector<16x256xf32>, vector<32x256xf32> -> vector<32x256xf32>
    %c0_18 = arith.constant 0 : index
    %c0_19 = arith.constant 0 : index
    %52 = vector.load %arg7[%c0_18, %c0_19] : memref<32x1xf32, #tpu.memory_space<vmem>>, vector<32x1xf32>
    %53 = vector.broadcast %52 : vector<32x1xf32> to vector<32x256xf32>
    %54 = arith.addf %51, %53 : vector<32x256xf32>
    %55 = arith.addf %54, %1 : vector<32x256xf32>
    %cst_20 = arith.constant 0.000000e+00 : f32
    %56 = vector.broadcast %cst_20 : f32 to vector<32x256xf32>
    %57 = arith.maximumf %55, %56 : vector<32x256xf32>
    %58 = vector.shape_cast %57 : vector<32x256xf32> to vector<1x32x256xf32>
    %c0_21 = arith.constant 0 : index
    %c0_22 = arith.constant 0 : index
    %c0_23 = arith.constant 0 : index
    %59 = vector.load %arg9[%c0_21, %c0_22, %c0_23] : memref<1x32x256xf32, #tpu.memory_space<vmem>>, vector<1x32x256xf32>
    tpu.vector_store %arg9[%c0_21, %c0_22, %c0_23], %58 {strides = array<i32>} : memref<1x32x256xf32, #tpu.memory_space<vmem>>, vector<1x32x256xf32>,
    return
  }
  func.func @transform_0(%arg0: i32) -> (i32, i32, i32) {
    %c0_i32 = arith.constant 0 : i32
    %c0_i32_0 = arith.constant 0 : i32
    %c0_i32_1 = arith.constant 0 : i32
    return %arg0, %c0_i32, %c0_i32_0 : i32, i32, i32
  }
  func.func @transform_1(%arg0: i32) -> (i32, i32) {
    %c0_i32 = arith.constant 0 : i32
    %c0_i32_0 = arith.constant 0 : i32
    %c0_i32_1 = arith.constant 0 : i32
    return %c0_i32, %c0_i32_0 : i32, i32
  }
  func.func @transform_2(%arg0: i32) -> (i32, i32) {
    %c0_i32 = arith.constant 0 : i32
    %c0_i32_0 = arith.constant 0 : i32
    %c0_i32_1 = arith.constant 0 : i32
    return %c0_i32, %c0_i32_0 : i32, i32
  }
  func.func @transform_3(%arg0: i32) -> (i32, i32) {
    %c0_i32 = arith.constant 0 : i32
    %c0_i32_0 = arith.constant 0 : i32
    %c0_i32_1 = arith.constant 0 : i32
    return %c0_i32, %c0_i32_0 : i32, i32
  }
  func.func @transform_4(%arg0: i32) -> (i32, i32) {
    %c0_i32 = arith.constant 0 : i32
    %c0_i32_0 = arith.constant 0 : i32
    %c0_i32_1 = arith.constant 0 : i32
    return %c0_i32, %c0_i32_0 : i32, i32
  }
  func.func @transform_5(%arg0: i32) -> (i32, i32) {
    %c0_i32 = arith.constant 0 : i32
    %c0_i32_0 = arith.constant 0 : i32
    %c0_i32_1 = arith.constant 0 : i32
    return %c0_i32, %c0_i32_0 : i32, i32
  }
  func.func @transform_6(%arg0: i32) -> (i32, i32) {
    %c0_i32 = arith.constant 0 : i32
    %c0_i32_0 = arith.constant 0 : i32
    %c0_i32_1 = arith.constant 0 : i32
    return %c0_i32, %c0_i32_0 : i32, i32
  }
  func.func @transform_7(%arg0: i32) -> (i32, i32) {
    %c0_i32 = arith.constant 0 : i32
    %c0_i32_0 = arith.constant 0 : i32
    %c0_i32_1 = arith.constant 0 : i32
    return %c0_i32, %c0_i32_0 : i32, i32
  }
  func.func @transform_8(%arg0: i32) -> (i32, i32, i32) {
    %c0_i32 = arith.constant 0 : i32
    %c0_i32_0 = arith.constant 0 : i32
    %c0_i32_1 = arith.constant 0 : i32
    return %arg0, %c0_i32, %c0_i32_0 : i32, i32, i32
  }
}

</mosaic_0001>

<bundles_post_ra>
// kernel: residual131_forward.1
= control target key start
LH: loop header
LB: loop body
LE: loop exit
PB: predicated region body
PF: predicated region fallthrough
CT: control target
= control target key end

     0   :  { %s1088_s27 = smov 0   ;;  %s1419_s0 = inlined_call_operand.vmem [shape: f32[2,32,256], index: 0, kind: input, shape index: {}]   ;;  %s1420_s1 = inlined_call_operand.vmem [shape: f32[16,32], index: 1, kind: input, shape index: {}]   ;;  %s1421_s2 = inlined_call_operand.vmem [shape: f32[16,1], index: 2, kind: input, shape index: {}]   ;;  %s1422_s3 = inlined_call_operand.vmem [shape: f32[16,144], index: 3, kind: input, shape index: {}]   ;;  %s1423_s4 = inlined_call_operand.vmem [shape: f32[16,1], index: 4, kind: input, shape index: {}]   ;;  %s1424_s5 = inlined_call_operand.vmem [shape: f32[32,16], index: 5, kind: input, shape index: {}]   ;;  %s1425_s6 = inlined_call_operand.vmem [shape: f32[32,1], index: 6, kind: input, shape index: {}]   ;;  %s1426_s7 = inlined_call_operand.vmem [shape: f32[9,256], index: 7, kind: input, shape index: {}]   ;;  %s1427_s8 = inlined_call_operand.vmem [shape: f32[2,32,256], index: 8, kind: output, shape index: {}]  }
   0x1 LB: > { %s934_s28 = sadd.s32 4294967295, %s1031_s27   ;;  %p938_p0 = scmp.ge.s32.totalorder %s1031_s27, 1  ;;  %s1031_s27 = sphi %s1088_s27, %s18_s27  }
   0x2   : > { %p262_p1 = scmp.lt.s32.totalorder %s1031_s27, 3 }
   0x4   : > { %p263_p2 = pnand %p938_p0, %p262_p1 }
   0x5   : > { %p296_p3 = scmp.lt.s32.totalorder (!%p263_p2), %s934_s28, 1  ;;  %v1033_v0 = vmov (!%p263_p2), 0.0   ;;  %v1034_v1 = vmov (!%p263_p2), 0   ;;  %v316_v2 = vld [vmem:[%s1421_s2] sm:$0xff] (!%p263_p2)  ;;  %v317_v3 = vld [vmem:[%s1421_s2 + $0x8] sm:$0xff] (!%p263_p2)  ;;  %vm328_vm0 = vcmask (!%p263_p2), 261120   ;;  %v428_v51 = vlaneseq (!%p263_p2) }
   0x6   : > { %266 = sbr.rel (%p263_p2) target bundleno = 890 (0x37a), region = 52  ;;  %399 = vmatprep.mubr.f32.mxu0 (!%p263_p2), %v1033_v0  ;;  %1023 = vset.pattern.permute.xlu0 (!%p263_p2), %v1034_v1  ;;  %v314_v16 = vld [vmem:[%s1420_s1] sm:$0xff] (!%p263_p2)  ;;  %v315_v17 = vld [vmem:[%s1420_s1 + $0x8] sm:$0xff] (!%p263_p2)  ;;  %s1035_s19 = smov (!%p263_p2), 16   ;;  %vm638_vm1 = vcmask (!%p263_p2), 130048   ;;  %v732_v37 = vld [vmem:[%s1425_s6 + $0x10] sm:$0xff] (!%p263_p2) }
   0x7   : > { %320 = vperm.xlu0 (!%p263_p2), %1023, %v316_v2   ;;  %1024 = vset.pattern.permute.xlu1 (!%p263_p2), %v1034_v1  ;;  %s1036_s20 = smov (!%p263_p2), 17   ;;  %s1037_s21 = smov (!%p263_p2), 15   ;;  %v626_v34 = vld [vmem:[%s1423_s4] sm:$0xff] (!%p263_p2)  ;;  %v623_v35 = vld [vmem:[%s1422_s3 + $0x8] sm:$0xff] (!%p263_p2)  ;;  %v733_v40 = vld [vmem:[%s1425_s6 + $0x18] sm:$0xff] (!%p263_p2)  ;;  %v1225_v54 = vshrl.u32 (!%p263_p2), %v428_v51, 7 }
   0x8   : > { %s1038_s22 = smov (!%p263_p2), 1   ;;  %s1039_s23 = smov (!%p263_p2), 127   ;;  %947 = vmatprep.mubr.msk.f32.mxu1 (!%p263_p2), %vm638_vm1, %v623_v35  ;;  %v730_v36 = vld [vmem:[%s1425_s6] sm:$0xff] (!%p263_p2)  ;;  %v627_v38 = vld [vmem:[%s1423_s4 + $0x8] sm:$0xff] (!%p263_p2)  ;;  %v1227_v55 = vand.u32 (!%p263_p2), 127, %v428_v51 }
   0x9   : > { %s1040_s24 = smov (!%p263_p2), 113   ;;  %s1041_s25 = smov (!%p263_p2), 112   ;;  %v731_v39 = vld [vmem:[%s1425_s6 + $0x8] sm:$0xff] (!%p263_p2)  ;;  %v437_v58 = vsub.s32 (!%p263_p2), 0, %v1225_v54  ;;  %v1235_v59 = vld [vmem:[%s1426_s7] sm:$0xff] (!%p263_p2)  ;;  %v462_v63 = vsub.s32 (!%p263_p2), 1, %v1225_v54 }
   0xa   : > { %s1042_s26 = smov (!%p263_p2), 111   ;;  %v1240_v60 = vld [vmem:[%s1426_s7 + $0x8] sm:$0xff] (!%p263_p2)  ;;  %vm430_vm2 = vcmp.lt.s32.totalorder (!%p263_p2), %v1227_v55, 17  ;;  %vm455_vm3 = vcmp.lt.s32.totalorder (!%p263_p2), %v1227_v55, 16  ;;  %vm480_vm4 = vcmp.lt.s32.totalorder (!%p263_p2), %v1227_v55, 15  ;;  %vm505_vm5 = vcmp.lt.s32.totalorder (!%p263_p2), %v1227_v55, 1 }
   0xb   : > { %325 = vperm.xlu0 (!%p263_p2), %1023, %v317_v3   ;;  %v438_v1 = vrot.slane (!%p263_p2), %v1235_v59, %v437_v58  ;;  %v442_v2 = vrot.slane (!%p263_p2), %v1240_v60, %v437_v58  ;;  %vm530_vm6 = vcmp.lt.s32.totalorder (!%p263_p2), %v1227_v55, 127  ;;  %vm555_vm7 = vcmp.lt.s32.totalorder (!%p263_p2), %v1227_v55, 113 }
   0xc   : > { %vm580_vm8 = vcmp.lt.s32.totalorder (!%p263_p2), %v1227_v55, 112  ;;  %vm605_vm9 = vcmp.lt.s32.totalorder (!%p263_p2), %v1227_v55, 111  ;;  %v624_v55 = vld [vmem:[%s1422_s3 + $0x10] sm:$0xff] (!%p263_p2) }
   0xd   : > { %s1429_s28 = smov (!%p296_p3, %s934_s28), 1 }
   0xe   : > { %s955_s11 = sshll.u32 %s1429_s28, 6 }
   0xf   : > { %s300_s14 = scalar_lea.vmem %s1419_s0, %s955_s11  ;;  %s1399_s29 = scalar_lea.vmem %s1427_s8, %s955_s11 }
  0x10   : > { %v1111_v4 = vld [vmem:[%s300_s14 + $0x8] sm:$0xff]  ;;  %v1113_v5 = vld [vmem:[%s300_s14 + $0x18] sm:$0xff]  ;;  %v1115_v6 = vld [vmem:[%s300_s14] sm:$0xff] }
  0x11   : > { %v957_v7 = vpack.c.bf16 %v1113_v5, %v1111_v4  ;;  %v1119_v8 = vld [vmem:[%s300_s14 + $0x10] sm:$0xff]  ;;  %v1121_v9 = vld [vmem:[%s300_s14 + $0x28] sm:$0xff]  ;;  %v1123_v10 = vld [vmem:[%s300_s14 + $0x38] sm:$0xff] }
  0x12   : > { %v959_v11 = vpack.c.bf16 %v1119_v8, %v1115_v6  ;;  %v961_v12 = vpack.c.bf16 %v1123_v10, %v1121_v9  ;;  %v1129_v13 = vld [vmem:[%s300_s14 + $0x20] sm:$0xff]  ;;  %v1131_v14 = vld [vmem:[%s300_s14 + $0x30] sm:$0xff] }
  0x13   : > { %958 = vmatprep.subr.bf16.mxu0 %v957_v7  ;;  %v963_v15 = vpack.c.bf16 %v1131_v14, %v1129_v13 }
  0x14   : > { %960 = vmatpush1.bf16.msra.mxu0 %v959_v11  ;;  %v487_v11 = vsub.s32 2, %v1225_v54 }
  0x15   : > { %962 = vmatprep.subr.bf16.mxu0 %v961_v12 }
  0x18   : > { %964 = vmatpush1.bf16.msra.mxu0 %v963_v15 }
  0x1b   : > { %943 = vmatmul.mubr.msk.f32.vlgmr.msra.gmra.mrb[0].mxu0 %vm328_vm0, %v314_v16  ;;  %v463_v16 = vrot.slane %v1235_v59, %v462_v63 }
  0x1c   : > { %405 = vmatprep.mubr.f32.mxu0 %v1033_v0 }
  0x1f   : > { %944 = vmatmul.mubr.msk.f32.gmra.mrb[2].mxu0 %vm328_vm0, %v315_v17  ;;  %v467_v17 = vrot.slane %v1240_v60, %v462_v63 }
  0x20   : > { %830 = vmatprep.mubr.f32.mxu0 %v1033_v0 }
  0x86   : > { %v321_v18 = vpop.permute.xlu0 %320 }
  0x8a   : > { %v326_v23 = vpop.permute.xlu0 %325 }
  0xee   : > { %v401_v19 = vpop.f32.mrb[0].mxu0 }
  0xef   : > { %v402_v20 = vadd.f32 %v401_v19, %v321_v18  ;;  %v403_v21 = vpop.f32.mrb[1].mxu0 }
  0xf0   : > { %v404_v24 = vadd.f32 %v403_v21, %v321_v18 }
  0xf1   : > { %v1143_v22 = vmax.f32 %v402_v20, 0.0 }
  0xf2   : > { %v407_v25 = vpop.f32.mrb[2].mxu0  ;;  %v1150_v30 = vmax.f32 %v404_v24, 0.0 }
  0xf3   : > { %v408_v26 = vadd.f32 %v407_v25, %v326_v23  ;;  %v409_v27 = vpop.f32.mrb[3].mxu0  ;;  %447 = vrot.lane.b32.xlu0 %v1143_v22, %s1035_s19  ;;  %420 = vrot.lane.b32.xlu1 %v1143_v22, %s1036_s20 }
  0xf4   : > { %v410_v28 = vadd.f32 %v409_v27, %v326_v23  ;;  %v488_v27 = vrot.slane %v1235_v59, %v487_v11 }
  0xf5   : > { %v1148_v29 = vmax.f32 %v408_v26, 0.0 }
  0xf6   : > { %v1152_v31 = vmax.f32 %v410_v28, 0.0 }
  0xf7   : > { %472 = vrot.lane.b32.xlu0 %v1143_v22, %s1037_s21  ;;  %422 = vrot.lane.b32.xlu1 %v1148_v29, %s1036_s20  ;;  %v983_v32 = vpack.c.bf16 %v1148_v29, %v1143_v22 }
  0xf8   : > { %v981_v33 = vpack.c.bf16 %v1152_v31, %v1150_v30 }
  0xfb   : > { %497 = vrot.lane.b32.xlu0 %v1143_v22, %s1038_s22  ;;  %449 = vrot.lane.b32.xlu1 %v1148_v29, %s1035_s19 }
  0xff   : > { %522 = vrot.lane.b32.xlu0 %v1143_v22, %s1039_s23  ;;  %474 = vrot.lane.b32.xlu1 %v1148_v29, %s1037_s21 }
 0x103   : > { %547 = vrot.lane.b32.xlu0 %v1143_v22, %s1040_s24  ;;  %499 = vrot.lane.b32.xlu1 %v1148_v29, %s1038_s22 }
 0x107   : > { %572 = vrot.lane.b32.xlu0 %v1143_v22, %s1041_s25  ;;  %524 = vrot.lane.b32.xlu1 %v1148_v29, %s1039_s23 }
 0x10b   : > { %424 = vrot.lane.b32.xlu0 %v1150_v30, %s1036_s20  ;;  %549 = vrot.lane.b32.xlu1 %v1148_v29, %s1040_s24 }
 0x10f   : > { %451 = vrot.lane.b32.xlu0 %v1150_v30, %s1035_s19  ;;  %574 = vrot.lane.b32.xlu1 %v1148_v29, %s1041_s25 }
 0x113   : > { %476 = vrot.lane.b32.xlu0 %v1150_v30, %s1037_s21  ;;  %426 = vrot.lane.b32.xlu1 %v1152_v31, %s1036_s20 }
 0x117   : > { %501 = vrot.lane.b32.xlu0 %v1150_v30, %s1038_s22  ;;  %453 = vrot.lane.b32.xlu1 %v1152_v31, %s1035_s19 }
 0x11b   : > { %597 = vrot.lane.b32.xlu0 %v1143_v22, %s1042_s26  ;;  %478 = vrot.lane.b32.xlu1 %v1152_v31, %s1037_s21 }
 0x11f   : > { %526 = vrot.lane.b32.xlu0 %v1150_v30, %s1039_s23  ;;  %503 = vrot.lane.b32.xlu1 %v1152_v31, %s1038_s22 }
 0x123   : > { %551 = vrot.lane.b32.xlu0 %v1150_v30, %s1040_s24  ;;  %599 = vrot.lane.b32.xlu1 %v1148_v29, %s1042_s26 }
 0x127   : > { %576 = vrot.lane.b32.xlu0 %v1150_v30, %s1041_s25  ;;  %528 = vrot.lane.b32.xlu1 %v1152_v31, %s1039_s23 }
 0x12b   : > { %601 = vrot.lane.b32.xlu0 %v1150_v30, %s1042_s26  ;;  %553 = vrot.lane.b32.xlu1 %v1152_v31, %s1040_s24 }
 0x12f   : > { %630 = vperm.xlu0 %1023, %v626_v34   ;;  %578 = vrot.lane.b32.xlu1 %v1152_v31, %s1041_s25 }
 0x133   : > { %736 = vperm.xlu0 %1023, %v730_v36   ;;  %603 = vrot.lane.b32.xlu1 %v1152_v31, %s1042_s26 }
 0x137   : > { %746 = vperm.xlu0 %1023, %v732_v37   ;;  %635 = vperm.xlu1 %1024, %v627_v38   ;;  %v492_v37 = vrot.slane %v1240_v60, %v487_v11  ;;  %v512_v38 = vsub.s32 3, %v1225_v54 }
 0x13b   : > { %741 = vperm.xlu1 %1024, %v731_v39  }
 0x13f   : > { %751 = vperm.xlu1 %1024, %v733_v40  }
 0x165   : > { %v448_v41 = vpop.permute.xlu0 %447  ;;  %v421_v42 = vpop.permute.xlu1 %420 }
 0x169   : > { %v473_v43 = vpop.permute.xlu0 %472  ;;  %v423_v44 = vpop.permute.xlu1 %422 }
 0x16d   : > { %v1213_v45 = vpop.permute.xlu0 %497  ;;  %v450_v46 = vpop.permute.xlu1 %449 }
 0x171   : > { %v1215_v47 = vpop.permute.xlu0 %522  ;;  %v475_v48 = vpop.permute.xlu1 %474 }
 0x175   : > { %v1217_v49 = vpop.permute.xlu0 %547  ;;  %v1219_v50 = vpop.permute.xlu1 %499 }
 0x179   : > { %v1221_v52 = vpop.permute.xlu0 %572  ;;  %v1223_v53 = vpop.permute.xlu1 %524 }
 0x17d   : > { %v425_v56 = vpop.permute.xlu0 %424  ;;  %v1229_v57 = vpop.permute.xlu1 %549 }
 0x17e   : > { %v431_v3 = vsel %vm430_vm2, %v421_v42, %v425_v56  ;;  %v433_v7 = vsel %vm430_vm2, %v425_v56, %v421_v42 }
 0x17f   : > { %v443_v20 = vmul.f32 %v438_v1, %v433_v7  ;;  %v444_v23 = vmul.f32 %v442_v2, %v431_v3  ;;  %v517_v3 = vrot.slane %v1240_v60, %v512_v38 }
 0x181   : > { %v452_v61 = vpop.permute.xlu0 %451  ;;  %v1243_v62 = vpop.permute.xlu1 %574 }
 0x182   : > { %v456_v25 = vsel %vm455_vm3, %v448_v41, %v452_v61  ;;  %v458_v26 = vsel %vm455_vm3, %v452_v61, %v448_v41 }
 0x183   : > { %v468_v42 = vmul.f32 %v463_v16, %v458_v26  ;;  %v469_v41 = vmul.f32 %v467_v17, %v456_v25 }
 0x185   : > { %v477_v12 = vpop.permute.xlu0 %476  ;;  %v427_v15 = vpop.permute.xlu1 %426 }
 0x186   : > { %v432_v18 = vsel %vm430_vm2, %v423_v44, %v427_v15  ;;  %v434_v19 = vsel %vm430_vm2, %v427_v15, %v423_v44  ;;  %v481_v56 = vsel %vm480_vm4, %v473_v43, %v477_v12  ;;  %v483_v58 = vsel %vm480_vm4, %v477_v12, %v473_v43 }
 0x187   : > { %v445_v21 = vmul.f32 %v438_v1, %v434_v19  ;;  %v446_v24 = vmul.f32 %v442_v2, %v432_v18  ;;  %v493_v15 = vmul.f32 %v488_v27, %v483_v58  ;;  %v494_v43 = vmul.f32 %v492_v37, %v481_v56 }
 0x188   : > { %v587_v56 = vsub.s32 7, %v1225_v54 }
 0x189   : > { %v502_v28 = vpop.permute.xlu0 %501  ;;  %v454_v34 = vpop.permute.xlu1 %453  ;;  %v965_v35 = vpack.c.bf16 %v446_v24, %v444_v23  ;;  %v967_v36 = vpack.c.bf16 %v445_v21, %v443_v20 }
 0x18a   : > { %v457_v39 = vsel %vm455_vm3, %v450_v46, %v454_v34  ;;  %v459_v40 = vsel %vm455_vm3, %v454_v34, %v450_v46  ;;  %v513_v46 = vrot.slane %v1235_v59, %v512_v38  ;;  %v508_v18 = vsel %vm505_vm5, %v502_v28, %v1213_v45 }
 0x18b   : > { %v470_v44 = vmul.f32 %v463_v16, %v459_v40  ;;  %v471_v51 = vmul.f32 %v467_v17, %v457_v39  ;;  %966 = vmatprep.subr.bf16.mxu1 %v965_v35  ;;  %v506_v17 = vsel %vm505_vm5, %v1213_v45, %v502_v28  ;;  %v562_v45 = vsub.s32 6, %v1225_v54 }
 0x18c   : > { %968 = vmatpush1.bf16.msra.mxu1 %v967_v36  ;;  %v518_v26 = vmul.f32 %v513_v46, %v508_v18 }
 0x18d   : > { %v1269_v61 = vpop.permute.xlu0 %597  ;;  %v479_v63 = vpop.permute.xlu1 %478  ;;  %v969_v1 = vpack.c.bf16 %v471_v51, %v469_v41  ;;  %v971_v2 = vpack.c.bf16 %v470_v44, %v468_v42  ;;  %v563_v41 = vrot.slane %v1235_v59, %v562_v45  ;;  %v567_v51 = vrot.slane %v1240_v60, %v562_v45 }
 0x18e   : > { %v482_v7 = vsel %vm480_vm4, %v475_v48, %v479_v63  ;;  %v484_v11 = vsel %vm480_vm4, %v479_v63, %v475_v48  ;;  %v537_v48 = vsub.s32 5, %v1225_v54 }
 0x18f   : > { %v495_v12 = vmul.f32 %v488_v27, %v484_v11  ;;  %v496_v16 = vmul.f32 %v492_v37, %v482_v7  ;;  %970 = vmatprep.subr.bf16.mxu1 %v969_v1  ;;  %v519_v27 = vmul.f32 %v517_v3, %v506_v17  ;;  %v588_v7 = vrot.slane %v1235_v59, %v587_v56 }
 0x190   : > { %972 = vmatpush1.bf16.msra.mxu1 %v971_v2  ;;  %v538_v39 = vrot.slane %v1235_v59, %v537_v48  ;;  %v542_v40 = vrot.slane %v1240_v60, %v537_v48  ;;  %v592_v11 = vrot.slane %v1240_v60, %v587_v56 }
 0x191   : > { %v527_v19 = vpop.permute.xlu0 %526  ;;  %v504_v20 = vpop.permute.xlu1 %503  ;;  %v973_v21 = vpack.c.bf16 %v496_v16, %v494_v43  ;;  %v975_v23 = vpack.c.bf16 %v495_v12, %v493_v15 }
 0x192   : > { %v507_v24 = vsel %vm505_vm5, %v1219_v50, %v504_v20  ;;  %v509_v25 = vsel %vm505_vm5, %v504_v20, %v1219_v50  ;;  %v531_v50 = vsel %vm530_vm6, %v1215_v47, %v527_v19  ;;  %v533_v42 = vsel %vm530_vm6, %v527_v19, %v1215_v47 }
 0x193   : > { %v520_v34 = vmul.f32 %v513_v46, %v509_v25  ;;  %v521_v35 = vmul.f32 %v517_v3, %v507_v24  ;;  %974 = vmatprep.subr.bf16.mxu1 %v973_v21  ;;  %v543_v63 = vmul.f32 %v538_v39, %v531_v50  ;;  %v544_v1 = vmul.f32 %v542_v40, %v533_v42  ;;  %v946_v24 = vld [vmem:[%s1426_s7 + $0x18] ss:$0 sm:$0xff]  ;;  %v622_v50 = vld [vmem:[%s1422_s3] sm:$0xff] }
 0x194   : > { %976 = vmatpush1.bf16.msra.mxu1 %v975_v23  ;;  %v625_v42 = vld [vmem:[%s1422_s3 + $0x18] sm:$0xff] }
 0x195   : > { %v552_v28 = vpop.permute.xlu0 %551  ;;  %v1292_v36 = vpop.permute.xlu1 %599  ;;  %v977_v37 = vpack.c.bf16 %v521_v35, %v519_v27  ;;  %v979_v38 = vpack.c.bf16 %v520_v34, %v518_v26 }
 0x196   : > { %v556_v30 = vsel %vm555_vm7, %v1217_v49, %v552_v28  ;;  %v558_v31 = vsel %vm555_vm7, %v552_v28, %v1217_v49 }
 0x197   : > { %978 = vmatprep.subr.bf16.mxu1 %v977_v37  ;;  %v568_v43 = vmul.f32 %v563_v41, %v556_v30  ;;  %v569_v22 = vmul.f32 %v567_v51, %v558_v31 }
 0x198   : > { %980 = vmatpush1.bf16.msra.mxu1 %v979_v38 }
 0x199   : > { %982 = vmatprep.subr.bf16.mxu1 %v981_v33  ;;  %v529_v44 = vpop.permute.xlu1 %528  ;;  %v577_v2 = vpop.permute.xlu0 %576 }
 0x19a   : > { %v532_v58 = vsel %vm530_vm6, %v1223_v53, %v529_v44  ;;  %v534_v47 = vsel %vm530_vm6, %v529_v44, %v1223_v53  ;;  %v581_v12 = vsel %vm580_vm8, %v1221_v52, %v577_v2  ;;  %v583_v59 = vsel %vm580_vm8, %v577_v2, %v1221_v52  ;;  %v945_v52 = vld [vmem:[%s1426_s7 + $0x10] ss:$0 sm:$0xff] }
 0x19b   : > { %v545_v46 = vmul.f32 %v538_v39, %v532_v58  ;;  %v546_v3 = vmul.f32 %v542_v40, %v534_v47  ;;  %v593_v20 = vmul.f32 %v588_v7, %v581_v12  ;;  %v594_v21 = vmul.f32 %v592_v11, %v583_v59 }
 0x19c   : > { %984 = vmatpush1.bf16.msra.mxu1 %v983_v32 }
 0x19d   : > { %v554_v33 = vpop.permute.xlu1 %553  ;;  %v985_v53 = vpack.c.bf16 %v546_v3, %v544_v1  ;;  %v987_v54 = vpack.c.bf16 %v545_v46, %v543_v63  ;;  %v602_v60 = vpop.permute.xlu0 %601 }
 0x19e   : > { %v557_v15 = vsel %vm555_vm7, %v1229_v57, %v554_v33  ;;  %v559_v49 = vsel %vm555_vm7, %v554_v33, %v1229_v57  ;;  %v606_v25 = vsel %vm605_vm9, %v1269_v61, %v602_v60 }
 0x19f   : > { %v570_v29 = vmul.f32 %v563_v41, %v557_v15  ;;  %v571_v32 = vmul.f32 %v567_v51, %v559_v49  ;;  %986 = vmatprep.subr.bf16.mxu1 %v985_v53  ;;  %v618_v28 = vmul.f32 %v945_v52, %v606_v25  ;;  %v729_v15 = vld [vmem:[%s1424_s5 + $0x18] sm:$0xff] }
 0x1a0   : > { %988 = vmatpush1.bf16.msra.mxu1 %v987_v54  ;;  %v726_v54 = vld [vmem:[%s1424_s5] sm:$0xff] }
 0x1a1   : > { %v579_v16 = vpop.permute.xlu1 %578  ;;  %v989_v17 = vpack.c.bf16 %v571_v32, %v569_v22  ;;  %v991_v57 = vpack.c.bf16 %v570_v29, %v568_v43 }
 0x1a2   : > { %v582_v18 = vsel %vm580_vm8, %v1243_v62, %v579_v16  ;;  %v584_v19 = vsel %vm580_vm8, %v579_v16, %v1243_v62  ;;  %v608_v62 = vsel %vm605_vm9, %v602_v60, %v1269_v61 }
 0x1a3   : > { %v595_v23 = vmul.f32 %v588_v7, %v582_v18  ;;  %v596_v48 = vmul.f32 %v592_v11, %v584_v19  ;;  %990 = vmatprep.subr.bf16.mxu1 %v989_v17  ;;  %v619_v37 = vmul.f32 %v946_v24, %v608_v62  ;;  %v727_v7 = vld [vmem:[%s1424_s5 + $0x8] sm:$0xff]  ;;  %v728_v11 = vld [vmem:[%s1424_s5 + $0x10] sm:$0xff] }
 0x1a4   : > { %992 = vmatpush1.bf16.msra.mxu1 %v991_v57 }
 0x1a5   : > { %v604_v26 = vpop.permute.xlu1 %603  ;;  %v993_v27 = vpack.c.bf16 %v596_v48, %v594_v21  ;;  %v995_v34 = vpack.c.bf16 %v595_v23, %v593_v20 }
 0x1a6   : > { %v607_v35 = vsel %vm605_vm9, %v1292_v36, %v604_v26  ;;  %v609_v45 = vsel %vm605_vm9, %v604_v26, %v1292_v36 }
 0x1a7   : > { %v620_v38 = vmul.f32 %v945_v52, %v607_v35  ;;  %v621_v39 = vmul.f32 %v946_v24, %v609_v45  ;;  %994 = vmatprep.subr.bf16.mxu1 %v993_v27 }
 0x1a8   : > { %996 = vmatpush1.bf16.msra.mxu1 %v995_v34 }
 0x1a9   : > { %v997_v40 = vpack.c.bf16 %v621_v39, %v619_v37  ;;  %v999_v61 = vpack.c.bf16 %v620_v38, %v618_v28 }
 0x1ab   : > { %998 = vmatprep.subr.bf16.mxu1 %v997_v40 }
 0x1ac   : > { %1000 = vmatpush1.bf16.msra.mxu1 %v999_v61 }
 0x1ae   : > { %v631_v44 = vpop.permute.xlu0 %630 }
 0x1af   : > { %710 = vmatmul.mubr.f32.vlgmr.msra.gmra.mrb[0].mxu1 %v622_v50 }
 0x1b0   : > { %948 = vmatprep.mubr.msk.f32.mxu1 %vm638_vm1, %v625_v42 }
 0x1b2   : > { %v737_v49 = vpop.permute.xlu0 %736 }
 0x1b3   : > { %716 = vmatmul.mubr.f32.gmra.mrb[2].mxu1 %v624_v55 }
 0x1b6   : > { %v636_v56 = vpop.permute.xlu1 %635  ;;  %v747_v20 = vpop.permute.xlu0 %746 }
 0x282   : > { %v711_v36 = vpop.f32.mrb[0].mxu1 }
 0x283   : > { %v713_v41 = vpop.f32.mrb[1].mxu1  ;;  %v712_v51 = vadd.f32 %v711_v36, %v631_v44 }
 0x284   : > { %v714_v58 = vadd.f32 %v713_v41, %v631_v44 }
 0x285   : > { %v722_v46 = vmax.f32 %v712_v51, 0.0 }
 0x286   : > { %v717_v47 = vpop.f32.mrb[2].mxu1  ;;  %v723_v30 = vmax.f32 %v714_v58, 0.0 }
 0x287   : > { %v718_v63 = vadd.f32 %v717_v47, %v636_v56  ;;  %v719_v1 = vpop.f32.mrb[3].mxu1 }
 0x288   : > { %v720_v2 = vadd.f32 %v719_v1, %v636_v56 }
 0x289   : > { %v724_v3 = vmax.f32 %v718_v63, 0.0 }
 0x28a   : > { %v725_v31 = vmax.f32 %v720_v2, 0.0 }
 0x28b   : > { %v1003_v33 = vpack.c.bf16 %v724_v3, %v722_v46 }
 0x28c   : > { %v1001_v53 = vpack.c.bf16 %v725_v31, %v723_v30 }
 0x28e   : > { %1002 = vmatprep.subr.bf16.mxu0 %v1001_v53 }
 0x28f   : > { %1004 = vmatpush1.bf16.msra.mxu0 %v1003_v33 }
 0x292   : > { %949 = vmatmul.mubr.msk.f32.vlgmr.msra.gmra.mrb[4].mxu0 %vm638_vm1, %v726_v54 }
 0x293   : > { %836 = vmatprep.mubr.f32.mxu0 %v1033_v0 }
 0x296   : > { %950 = vmatmul.mubr.msk.f32.gmra.mrb[6].mxu0 %vm638_vm1, %v727_v7 }
 0x297   : > { %842 = vmatprep.mubr.f32.mxu0 %v1033_v0 }
 0x29a   : > { %951 = vmatmul.mubr.msk.f32.gmra.mrb[8].mxu0 %vm638_vm1, %v728_v11 }
 0x29b   : > { %848 = vmatprep.mubr.f32.mxu0 %v1033_v0  ;;  %v742_v0 = vpop.permute.xlu1 %741 }
 0x29e   : > { %952 = vmatmul.mubr.msk.f32.gmra.mrb[10].mxu0 %vm638_vm1, %v729_v15 }
 0x29f   : > { %v752_v26 = vpop.permute.xlu1 %751 }
 0x365   : > { %v832_v43 = vpop.f32.mrb[4].mxu0 }
 0x366   : > { %v833_v22 = vadd.f32 %v832_v43, %v737_v49  ;;  %v834_v29 = vpop.f32.mrb[5].mxu0 }
 0x367   : > { %v835_v32 = vadd.f32 %v834_v29, %v737_v49 }
 0x368   : > { %v855_v12 = vadd.f32 %v833_v22, %v1115_v6 }
 0x369   : > { %v856_v59 = vadd.f32 %v835_v32, %v1111_v4  ;;  %v838_v60 = vpop.f32.mrb[6].mxu0 }
 0x36a   : > { %v863_v16 = vmax.f32 %v855_v12, 0.0  ;;  %v839_v17 = vadd.f32 %v838_v60, %v742_v0  ;;  %v840_v57 = vpop.f32.mrb[7].mxu0 }
 0x36b   : > { %v864_v18 = vmax.f32 %v856_v59, 0.0  ;;  %v841_v19 = vadd.f32 %v840_v57, %v742_v0 }
 0x36c   : > { %871 = vst [vmem:[%s1399_s29] sm:$0xff] %v863_v16  ;;  %v857_v6 = vadd.f32 %v839_v17, %v1119_v8 }
 0x36d   : > { %872 = vst [vmem:[%s1399_s29 + $0x8] sm:$0xff] %v864_v18  ;;  %v858_v21 = vadd.f32 %v841_v19, %v1113_v5  ;;  %v844_v23 = vpop.f32.mrb[8].mxu0 }
 0x36e   : > { %v865_v48 = vmax.f32 %v857_v6, 0.0  ;;  %v845_v52 = vadd.f32 %v844_v23, %v747_v20  ;;  %v846_v4 = vpop.f32.mrb[9].mxu0 }
 0x36f   : > { %v866_v24 = vmax.f32 %v858_v21, 0.0  ;;  %v847_v25 = vadd.f32 %v846_v4, %v747_v20 }
 0x370   : > { %873 = vst [vmem:[%s1399_s29 + $0x10] sm:$0xff] %v865_v48  ;;  %v859_v62 = vadd.f32 %v845_v52, %v1129_v13 }
 0x371   : > { %874 = vst [vmem:[%s1399_s29 + $0x18] sm:$0xff] %v866_v24  ;;  %v860_v8 = vadd.f32 %v847_v25, %v1121_v9  ;;  %v850_v27 = vpop.f32.mrb[10].mxu0 }
 0x372   : > { %v867_v34 = vmax.f32 %v859_v62, 0.0  ;;  %v851_v5 = vadd.f32 %v850_v27, %v752_v26  ;;  %v852_v35 = vpop.f32.mrb[11].mxu0 }
 0x373   : > { %v868_v45 = vmax.f32 %v860_v8, 0.0  ;;  %v853_v28 = vadd.f32 %v852_v35, %v752_v26 }
 0x374   : > { %875 = vst [vmem:[%s1399_s29 + $0x20] sm:$0xff] %v867_v34  ;;  %v861_v37 = vadd.f32 %v851_v5, %v1131_v14 }
 0x375   : > { %876 = vst [vmem:[%s1399_s29 + $0x28] sm:$0xff] %v868_v45  ;;  %v862_v38 = vadd.f32 %v853_v28, %v1123_v10 }
 0x376   : > { %v869_v39 = vmax.f32 %v861_v37, 0.0 }
 0x377   : > { %v870_v13 = vmax.f32 %v862_v38, 0.0 }
 0x378   : > { %877 = vst [vmem:[%s1399_s29 + $0x30] sm:$0xff] %v869_v39 }
 0x379   : > { %878 = vst [vmem:[%s1399_s29 + $0x38] sm:$0xff] %v870_v13 }
 0x37a PF: > { %s18_s27 = sadd.s32 1, %s1031_s27  }
 0x37b   : > { %p15_p4 = scmp.ge.s32.totalorder %s18_s27, 4  }
 0x37d   :  { %17 = sbr.rel (!%p15_p4) target bundleno = 1 (0x1), region = 82 }

</bundles_post_ra>
